<compile_context>
chip_gen: v7x
topology: tpu7x:2x2x1
jax: 0.10.0
libtpu: 0.0.40
codegen_flags: <defaults>
</compile_context>

<pallas_src>
import jax
import jax.numpy as jnp
from jax import lax
from jax.experimental import pallas as pl
from jax.experimental.pallas import tpu as pltpu

BN_EPS = 1e-5
LEAKY_SLOPE = 0.01          # torch.nn.LeakyReLU default negative_slope
N_HEADS = 5
HIDDEN = 256
NH = N_HEADS * HIDDEN       # 1280
OUT_PAD = 128               # lane-dense padded output width (logits in lanes 0..4)
W2_ROWS = 8                 # 5 head rows sublane-padded to 8


def _fused_model_kernel(x_ref, wf_ref, w1_ref, b1_ref, w2_ref, b2_ref, out_ref):
    # x_ref : (TILE_B, D)    bf16  flattened input tile
    # wf_ref: (D, F)         bf16  synthetic feature extractor weight
    # w1_ref: (F, NH)        bf16  per-head Linear(F->256), BN folded, heads stacked
    # b1_ref: (1, NH)        f32   BN + feature-extractor bias folded in
    # w2_ref: (8, NH)        bf16  row h = head h's 256-vector in cols h*H:(h+1)*H
    # b2_ref: (1, 8)         f32   lanes 0..4 = head output biases
    # out_ref: (TILE_B, 128) f32   logits in lanes 0..4
    feats = jnp.dot(x_ref[...], wf_ref[...], preferred_element_type=jnp.float32)

    # Linear(F->256) for all 5 heads at once (BN + bf already folded into w1/b1).
    h = jnp.dot(feats.astype(jnp.bfloat16), w1_ref[...],
                preferred_element_type=jnp.float32) + b1_ref[...]

    # Dropout(p=0.2) on head 0 is inactive in eval mode (identity).
    # LeakyReLU(0.01) in f32.
    h = jnp.where(h > 0, h, LEAKY_SLOPE * h)

    # Compact head matmul: contract the 1280 axis against the (8, 1280) weight.
    y = lax.dot_general(h.astype(jnp.bfloat16), w2_ref[...],
                        dimension_numbers=(((1,), (1,)), ((), ())),
                        preferred_element_type=jnp.float32) + b2_ref[...]

    # Lane-pad (TILE_B, 8) -> (TILE_B, 128) for an unmasked, lane-dense store.
    tile_b = y.shape[0]
    pad = jnp.zeros((tile_b, OUT_PAD - W2_ROWS), jnp.float32)
    out_ref[...] = jnp.concatenate([y, pad], axis=-1).astype(out_ref.dtype)


def fold_params(params):
    """Fold BN + feature-extractor bias into the first Linear, build stacked /
    compact weights, and cast matmul operands to bf16. Done once at setup."""
    F = params["wf"].shape[1]

    # BN (eval): y = (x - mean) * gamma/sqrt(var+eps) + beta
    scale = params["gamma"] * jax.lax.rsqrt(params["var"] + BN_EPS)    # (5,1,H)
    w1f = params["w1"] * scale                                         # (5,F,H)
    b1f = (params["b1"] - params["mean"]) * scale + params["beta"]     # (5,1,H)

    # Stack heads along the output dim: columns h*H:(h+1)*H belong to head h.
    w1s = jnp.transpose(w1f, (1, 0, 2)).reshape(F, NH)                 # f32
    b1s = jnp.transpose(b1f, (1, 0, 2)).reshape(1, NH)                 # f32

    # Fold feature-extractor bias: x@wf@w1 + (bf@w1 + b1).
    b1s = params["bf"].reshape(1, F) @ w1s + b1s

    # Compact W2: (8, NH) with row h holding head h's vector; rows 5..7 zero.
    w2c = jnp.zeros((W2_ROWS, NH), jnp.float32)
    b2c = jnp.zeros((1, W2_ROWS), jnp.float32)
    for h in range(N_HEADS):
        w2c = w2c.at[h, h * HIDDEN:(h + 1) * HIDDEN].set(params["w2"][h, :, 0])
        b2c = b2c.at[0, h].set(params["b2"][h, 0, 0])

    return {
        "wf": params["wf"].astype(jnp.bfloat16),
        "w1": w1s.astype(jnp.bfloat16),
        "b1": b1s,                               # biases stay f32
        "w2": w2c.astype(jnp.bfloat16),
        "b2": b2c,                               # biases stay f32
    }


def model_forward(x_nchw, fp):
    """x_nchw: [B, C, H, W] float32. fp: folded params. Returns [B, 5] logits."""
    B = x_nchw.shape[0]
    x_flat = x_nchw.reshape(B, -1).astype(jnp.bfloat16)
    D = x_flat.shape[1]
    F = fp["wf"].shape[1]

    # Batch tiling: weights stay resident (constant index maps); x/out stream.
    tile_b = 256 if B > 256 else max(8, ((B + 7) // 8) * 8)
    b_pad = pl.cdiv(B, tile_b) * tile_b
    if b_pad != B:
        x_flat = jnp.pad(x_flat, ((0, b_pad - B), (0, 0)))
    grid = (b_pad // tile_b,)

    out = pl.pallas_call(
        _fused_model_kernel,
        out_shape=jax.ShapeDtypeStruct((b_pad, OUT_PAD), jnp.float32),
        grid_spec=pltpu.PrefetchScalarGridSpec(
            num_scalar_prefetch=0,
            grid=grid,
            in_specs=[
                pl.BlockSpec((tile_b, D), lambda i: (i, 0)),        # x_flat
                pl.BlockSpec((D, F), lambda i: (0, 0)),             # wf
                pl.BlockSpec((F, NH), lambda i: (0, 0)),            # w1 (BN folded)
                pl.BlockSpec((1, NH), lambda i: (0, 0)),            # b1 (BN + bf folded)
                pl.BlockSpec((W2_ROWS, NH), lambda i: (0, 0)),      # w2 compact
                pl.BlockSpec((1, W2_ROWS), lambda i: (0, 0)),       # b2 compact
            ],
            out_specs=pl.BlockSpec((tile_b, OUT_PAD), lambda i: (i, 0)),
        ),
        compiler_params=pltpu.CompilerParams(
            dimension_semantics=("parallel",)),
    )(x_flat, fp["wf"], fp["w1"], fp["b1"], fp["w2"], fp["b2"])

    # lanes 0..4 hold the 5 head logits == torch.cat([c0..c4], dim=1)
    return out[:B, :N_HEADS]


def reference_forward(x_nchw, params):
    """Pure-JAX f32 reference (unfolded params, eval semantics)."""
    B = x_nchw.shape[0]
    feats = x_nchw.reshape(B, -1) @ params["wf"] + params["bf"]
    h = jnp.einsum("bf,nfh->nbh", feats, params["w1"]) + params["b1"]
    inv = jax.lax.rsqrt(params["var"] + BN_EPS)
    h = (h - params["mean"]) * (inv * params["gamma"]) + params["beta"]
    h = jnp.where(h > 0, h, LEAKY_SLOPE * h)
    y = jnp.einsum("nbh,nho->nbo", h, params["w2"]) + params["b2"]
    return jnp.transpose(y[..., 0], (1, 0))


def make_params(key, in_dim, feature_size, hidden=HIDDEN, n_heads=N_HEADS):
    ks = jax.random.split(key, 12)
    return {
        # synthetic feature extractor: flatten + Linear(in_dim -> feature_size)
        "wf": jax.random.normal(ks[0], (in_dim, feature_size), jnp.float32) * 0.02,
        "bf": jax.random.normal(ks[1], (feature_size,), jnp.float32) * 0.02,
        # stacked head params
        "w1": jax.random.normal(ks[2], (n_heads, feature_size, hidden), jnp.float32) * 0.05,
        "b1": jax.random.normal(ks[3], (n_heads, 1, hidden), jnp.float32) * 0.05,
        "gamma": 1.0 + 0.1 * jax.random.normal(ks[4], (n_heads, 1, hidden), jnp.float32),
        "beta": 0.1 * jax.random.normal(ks[5], (n_heads, 1, hidden), jnp.float32),
        "mean": 0.1 * jax.random.normal(ks[6], (n_heads, 1, hidden), jnp.float32),
        "var": 1.0 + 0.1 * jax.random.uniform(ks[7], (n_heads, 1, hidden), jnp.float32),
        "w2": jax.random.normal(ks[8], (n_heads, hidden, 1), jnp.float32) * 0.05,
        "b2": jax.random.normal(ks[9], (n_heads, 1, 1), jnp.float32) * 0.05,
    }


if __name__ == "__main__":
    key = jax.random.PRNGKey(0)
    kx, kp = jax.random.split(key)

    B, C, Hs, Ws = 2, 4, 16, 16          # NCHW input to the (synthetic) extractor
    feature_size = 32
    x = jax.random.normal(kx, (B, C, Hs, Ws), jnp.float32)

    params = make_params(kp, C * Hs * Ws, feature_size)
    folded = jax.tree_util.tree_map(jax.block_until_ready, fold_params(params))

    fwd = jax.jit(model_forward)
    out = jax.block_until_ready(fwd(x, folded))
    assert out.shape == (B, N_HEADS), out.shape

    ref = reference_forward(x, params)
    # bf16 matmul operands (f32 accumulation) -> loosened tolerance vs f32 ref.
    assert jnp.allclose(out, ref, atol=5e-2, rtol=5e-2), (out, ref)

    print("KERNEL_OK")
</pallas_src>

<mosaic_0001>
module attributes {stable_mosaic.version = 11 : i64} {
  func.func @_fused_model_kernel(%arg0: i32, %arg1: memref<8x1024xbf16, #tpu.memory_space<vmem>>, %arg2: memref<1024x32xbf16, #tpu.memory_space<vmem>>, %arg3: memref<32x1280xbf16, #tpu.memory_space<vmem>>, %arg4: memref<1x1280xf32, #tpu.memory_space<vmem>>, %arg5: memref<8x1280xbf16, #tpu.memory_space<vmem>>, %arg6: memref<1x8xf32, #tpu.memory_space<vmem>>, %arg7: memref<8x128xf32, #tpu.memory_space<vmem>>) attributes {dimension_semantics = [#tpu.dimension_semantics<parallel>], iteration_bounds = array<i64: 1>, scalar_prefetch = 0 : i64, scratch_operands = 0 : i64, tpu.core_type = #tpu.core_type<tc>, window_params = [{transform_indices = @transform_0, window_bounds = array<i64: 8, 1024>}, {pipeline_mode = #tpu.pipeline_mode<synchronous>, transform_indices = @transform_1, window_bounds = array<i64: 1024, 32>}, {pipeline_mode = #tpu.pipeline_mode<synchronous>, transform_indices = @transform_2, window_bounds = array<i64: 32, 1280>}, {pipeline_mode = #tpu.pipeline_mode<synchronous>, transform_indices = @transform_3, window_bounds = array<i64: 1, 1280>}, {pipeline_mode = #tpu.pipeline_mode<synchronous>, transform_indices = @transform_4, window_bounds = array<i64: 8, 1280>}, {pipeline_mode = #tpu.pipeline_mode<synchronous>, transform_indices = @transform_5, window_bounds = array<i64: 1, 8>}, {transform_indices = @transform_6, window_bounds = array<i64: 8, 128>}]} {
    %c0 = arith.constant 0 : index
    %c0_0 = arith.constant 0 : index
    %0 = vector.load %arg1[%c0, %c0_0] : memref<8x1024xbf16, #tpu.memory_space<vmem>>, vector<8x1024xbf16>
    %c0_1 = arith.constant 0 : index
    %c0_2 = arith.constant 0 : index
    %1 = vector.load %arg2[%c0_1, %c0_2] : memref<1024x32xbf16, #tpu.memory_space<vmem>>, vector<1024x32xbf16>
    %cst = arith.constant dense<0.000000e+00> : vector<8x32xf32>
    %2 = tpu.matmul %0, %1, %cst {dimension_numbers = #tpu.dot_dimension_numbers<[1], [0], [0], [1], [0, 0, 1, 1], [], []>} : vector<8x1024xbf16>, vector<1024x32xbf16>, vector<8x32xf32> -> vector<8x32xf32>
    %3 = arith.truncf %2 : vector<8x32xf32> to vector<8x32xbf16>
    %c0_3 = arith.constant 0 : index
    %c0_4 = arith.constant 0 : index
    %4 = vector.load %arg3[%c0_3, %c0_4] : memref<32x1280xbf16, #tpu.memory_space<vmem>>, vector<32x1280xbf16>
    %cst_5 = arith.constant dense<0.000000e+00> : vector<8x1280xf32>
    %5 = tpu.matmul %3, %4, %cst_5 {dimension_numbers = #tpu.dot_dimension_numbers<[1], [0], [0], [1], [0, 0, 1, 1], [], []>} : vector<8x32xbf16>, vector<32x1280xbf16>, vector<8x1280xf32> -> vector<8x1280xf32>
    %c0_6 = arith.constant 0 : index
    %c0_7 = arith.constant 0 : index
    %6 = vector.load %arg4[%c0_6, %c0_7] : memref<1x1280xf32, #tpu.memory_space<vmem>>, vector<1x1280xf32>
    %7 = vector.broadcast %6 : vector<1x1280xf32> to vector<8x1280xf32>
    %8 = arith.addf %5, %7 : vector<8x1280xf32>
    %cst_8 = arith.constant 0.000000e+00 : f32
    %9 = vector.broadcast %cst_8 : f32 to vector<8x1280xf32>
    %10 = arith.cmpf ogt, %8, %9 : vector<8x1280xf32>
    %cst_9 = arith.constant 0.00999999977 : f32
    %11 = vector.broadcast %cst_9 : f32 to vector<8x1280xf32>
    %12 = arith.mulf %11, %8 : vector<8x1280xf32>
    %13 = arith.select %10, %8, %12 : vector<8x1280xi1>, vector<8x1280xf32>
    %14 = arith.truncf %13 : vector<8x1280xf32> to vector<8x1280xbf16>
    %c0_10 = arith.constant 0 : index
    %c0_11 = arith.constant 0 : index
    %15 = vector.load %arg5[%c0_10, %c0_11] : memref<8x1280xbf16, #tpu.memory_space<vmem>>, vector<8x1280xbf16>
    %cst_12 = arith.constant dense<0.000000e+00> : vector<8x8xf32>
    %16 = tpu.matmul %14, %15, %cst_12 {dimension_numbers = #tpu.dot_dimension_numbers<[1], [1], [0], [0], [0, 0, 1, 0], [], []>} : vector<8x1280xbf16>, vector<8x1280xbf16>, vector<8x8xf32> -> vector<8x8xf32>
    %c0_13 = arith.constant 0 : index
    %c0_14 = arith.constant 0 : index
    %17 = vector.load %arg6[%c0_13, %c0_14] : memref<1x8xf32, #tpu.memory_space<vmem>>, vector<1x8xf32>
    %18 = vector.broadcast %17 : vector<1x8xf32> to vector<8x8xf32>
    %19 = arith.addf %16, %18 : vector<8x8xf32>
    %cst_15 = arith.constant 0.000000e+00 : f32
    %20 = vector.broadcast %cst_15 : f32 to vector<8x120xf32>
    %21 = tpu.concatenate %19, %20 in 1 : vector<8x8xf32>, vector<8x120xf32> -> vector<8x128xf32>
    %c0_16 = arith.constant 0 : index
    %c0_17 = arith.constant 0 : index
    %22 = vector.load %arg7[%c0_16, %c0_17] : memref<8x128xf32, #tpu.memory_space<vmem>>, vector<8x128xf32>
    tpu.vector_store %arg7[%c0_16, %c0_17], %21 {strides = array<i32>} : memref<8x128xf32, #tpu.memory_space<vmem>>, vector<8x128xf32>,
    return
  }
  func.func @transform_0(%arg0: i32) -> (i32, i32) {
    %c0_i32 = arith.constant 0 : i32
    %c0_i32_0 = arith.constant 0 : i32
    return %arg0, %c0_i32 : i32, i32
  }
  func.func @transform_1(%arg0: i32) -> (i32, i32) {
    %c0_i32 = arith.constant 0 : i32
    %c0_i32_0 = arith.constant 0 : i32
    %c0_i32_1 = arith.constant 0 : i32
    return %c0_i32, %c0_i32_0 : i32, i32
  }
  func.func @transform_2(%arg0: i32) -> (i32, i32) {
    %c0_i32 = arith.constant 0 : i32
    %c0_i32_0 = arith.constant 0 : i32
    %c0_i32_1 = arith.constant 0 : i32
    return %c0_i32, %c0_i32_0 : i32, i32
  }
  func.func @transform_3(%arg0: i32) -> (i32, i32) {
    %c0_i32 = arith.constant 0 : i32
    %c0_i32_0 = arith.constant 0 : i32
    %c0_i32_1 = arith.constant 0 : i32
    return %c0_i32, %c0_i32_0 : i32, i32
  }
  func.func @transform_4(%arg0: i32) -> (i32, i32) {
    %c0_i32 = arith.constant 0 : i32
    %c0_i32_0 = arith.constant 0 : i32
    %c0_i32_1 = arith.constant 0 : i32
    return %c0_i32, %c0_i32_0 : i32, i32
  }
  func.func @transform_5(%arg0: i32) -> (i32, i32) {
    %c0_i32 = arith.constant 0 : i32
    %c0_i32_0 = arith.constant 0 : i32
    %c0_i32_1 = arith.constant 0 : i32
    return %c0_i32, %c0_i32_0 : i32, i32
  }
  func.func @transform_6(%arg0: i32) -> (i32, i32) {
    %c0_i32 = arith.constant 0 : i32
    %c0_i32_0 = arith.constant 0 : i32
    return %arg0, %c0_i32 : i32, i32
  }
}

</mosaic_0001>

<bundles_post_ra>
// kernel: model_forward.1
= control target key start
LH: loop header
LB: loop body
LE: loop exit
PB: predicated region body
PF: predicated region fallthrough
CT: control target
= control target key end

     0   :  { %vm903_vm0 = vcmask 261120   ;;  %vm1399_vm11 = vcmask 64512   ;;  %s2092_s1 = inlined_call_operand.vmem [shape: bf16[1024,32], index: 1, kind: input, shape index: {}]   ;;  %s2093_s0 = inlined_call_operand.vmem [shape: bf16[8,1024], index: 0, kind: input, shape index: {}]   ;;  %s2094_s2 = inlined_call_operand.vmem [shape: bf16[32,1280], index: 2, kind: input, shape index: {}]   ;;  %s2095_s4 = inlined_call_operand.vmem [shape: bf16[8,1280], index: 4, kind: input, shape index: {}]   ;;  %s2096_s3 = inlined_call_operand.vmem [shape: f32[1,1280], index: 3, kind: input, shape index: {}]   ;;  %s2097_s5 = inlined_call_operand.vmem [shape: f32[1,8], index: 5, kind: input, shape index: {}]   ;;  %s2098_s6 = inlined_call_operand.vmem [shape: f32[8,128], index: 6, kind: output, shape index: {}]  }
   0x1   :  { %v1620_v0 = vld [vmem:[%s2092_s1 + $0x40] sm:$0xff]   ;;  %v1624_v4 = vld [vmem:[%s2092_s1 + $0x48] sm:$0xff]   ;;  %v1628_v8 = vld [vmem:[%s2092_s1 + $0x50] sm:$0xff]  }
   0x2   :  { %v1621_v1 = vld [vmem:[%s2092_s1 + $0xc0] sm:$0xff]   ;;  %1514 = vmatprep.subr.bf16.mxu0 %v1620_v0  ;;  %v1625_v5 = vld [vmem:[%s2092_s1 + $0xc8] sm:$0xff]   ;;  %v1629_v9 = vld [vmem:[%s2092_s1 + $0xd0] sm:$0xff]  }
   0x3   :  { %v1622_v2 = vld [vmem:[%s2092_s1] sm:$0xff]   ;;  %1536 = vmatprep.subr.bf16.mxu1 %v1621_v1  ;;  %v1626_v6 = vld [vmem:[%s2092_s1 + $0x8] sm:$0xff]   ;;  %v1630_v10 = vld [vmem:[%s2092_s1 + $0x10] sm:$0xff]  }
   0x4   :  { %v1623_v3 = vld [vmem:[%s2092_s1 + $0x80] sm:$0xff]   ;;  %1515 = vmatpush3.bf16.msra.mxu0 %v1622_v2  ;;  %v1627_v7 = vld [vmem:[%s2092_s1 + $0x88] sm:$0xff]   ;;  %v1631_v11 = vld [vmem:[%s2092_s1 + $0x90] sm:$0xff]  }
   0x5   :  { %1537 = vmatpush3.bf16.msra.mxu1 %v1623_v3  ;;  %1516 = vmatprep.subr.bf16.mxu0 %v1624_v4  ;;  %v1632_v12 = vld [vmem:[%s2092_s1 + $0x58] sm:$0xff]   ;;  %v1636_v16 = vld [vmem:[%s2092_s1 + $0x60] sm:$0xff]   ;;  %v1640_v20 = vld [vmem:[%s2092_s1 + $0x68] sm:$0xff]  }
   0x6   :  { %1538 = vmatprep.subr.bf16.mxu1 %v1625_v5  ;;  %v1633_v13 = vld [vmem:[%s2092_s1 + $0xd8] sm:$0xff]   ;;  %v1637_v17 = vld [vmem:[%s2092_s1 + $0xe0] sm:$0xff]   ;;  %v1641_v21 = vld [vmem:[%s2092_s1 + $0xe8] sm:$0xff]  }
   0x7   :  { %v1634_v14 = vld [vmem:[%s2092_s1 + $0x18] sm:$0xff]   ;;  %v1638_v18 = vld [vmem:[%s2092_s1 + $0x20] sm:$0xff]   ;;  %v1642_v22 = vld [vmem:[%s2092_s1 + $0x28] sm:$0xff]  }
   0x8   :  { %1517 = vmatpush3.bf16.msra.mxu0 %v1626_v6  ;;  %v1635_v15 = vld [vmem:[%s2092_s1 + $0x98] sm:$0xff]   ;;  %v1639_v19 = vld [vmem:[%s2092_s1 + $0xa0] sm:$0xff]   ;;  %v1643_v23 = vld [vmem:[%s2092_s1 + $0xa8] sm:$0xff]  }
   0x9   :  { %1539 = vmatpush3.bf16.msra.mxu1 %v1627_v7  ;;  %1518 = vmatprep.subr.bf16.mxu0 %v1628_v8  ;;  %v1644_v24 = vld [vmem:[%s2092_s1 + $0x70] sm:$0xff]   ;;  %v1648_v28 = vld [vmem:[%s2092_s1 + $0x78] sm:$0xff]   ;;  %v24_v32 = vld [vmem:[%s2093_s0] sm:$0xff] }
   0xa   :  { %1540 = vmatprep.subr.bf16.mxu1 %v1629_v9  ;;  %v1645_v25 = vld [vmem:[%s2092_s1 + $0xf0] sm:$0xff]   ;;  %v1649_v29 = vld [vmem:[%s2092_s1 + $0xf8] sm:$0xff]   ;;  %v25_v33 = vld [vmem:[%s2093_s0 + $0x8] sm:$0xff]  ;;  %v1406_v34 = vcombine.low %v24_v32, %v24_v32  ;;  %v1407_v35 = vcombine.high %v24_v32, %v24_v32 }
   0xb   :  { %v1646_v26 = vld [vmem:[%s2092_s1 + $0x30] sm:$0xff]   ;;  %v1650_v30 = vld [vmem:[%s2092_s1 + $0x38] sm:$0xff]   ;;  %v1408_v36 = vcombine.low %v25_v33, %v25_v33  ;;  %v1409_v37 = vcombine.high %v25_v33, %v25_v33  ;;  %v1656_v38 = vld [vmem:[%s2092_s1 + $0x140] sm:$0xff]  }
   0xc   :  { %1519 = vmatpush3.bf16.msra.mxu0 %v1630_v10  ;;  %v1647_v27 = vld [vmem:[%s2092_s1 + $0xb0] sm:$0xff]   ;;  %v1651_v31 = vld [vmem:[%s2092_s1 + $0xb8] sm:$0xff]   ;;  %v1657_v39 = vld [vmem:[%s2092_s1 + $0x1c0] sm:$0xff]   ;;  %600 = vmatprep.mubr.bf16.mxu0 %v1407_v35 }
   0xd   :  { %1541 = vmatpush3.bf16.msra.mxu1 %v1631_v11  ;;  %1520 = vmatprep.subr.bf16.mxu0 %v1632_v12  ;;  %v1658_v40 = vld [vmem:[%s2092_s1 + $0x100] sm:$0xff]   ;;  %v1660_v42 = vld [vmem:[%s2092_s1 + $0x148] sm:$0xff]   ;;  %v1664_v46 = vld [vmem:[%s2092_s1 + $0x150] sm:$0xff]  }
   0xe   :  { %1542 = vmatprep.subr.bf16.mxu1 %v1633_v13  ;;  %640 = vmatprep.mubr.bf16.mxu1 %v1409_v37  ;;  %v1659_v41 = vld [vmem:[%s2092_s1 + $0x180] sm:$0xff]   ;;  %v1661_v43 = vld [vmem:[%s2092_s1 + $0x1c8] sm:$0xff]   ;;  %v1665_v47 = vld [vmem:[%s2092_s1 + $0x1d0] sm:$0xff]  }
   0xf   :  { %v1662_v44 = vld [vmem:[%s2092_s1 + $0x108] sm:$0xff]   ;;  %v1666_v48 = vld [vmem:[%s2092_s1 + $0x110] sm:$0xff]   ;;  %v1668_v50 = vld [vmem:[%s2092_s1 + $0x158] sm:$0xff]  }
  0x10   :  { %1521 = vmatpush3.bf16.msra.mxu0 %v1634_v14  ;;  %v1663_v45 = vld [vmem:[%s2092_s1 + $0x188] sm:$0xff]   ;;  %v1667_v49 = vld [vmem:[%s2092_s1 + $0x190] sm:$0xff]   ;;  %v1669_v51 = vld [vmem:[%s2092_s1 + $0x1d8] sm:$0xff]  }
  0x11   :  { %1543 = vmatpush3.bf16.msra.mxu1 %v1635_v15  ;;  %1522 = vmatprep.subr.bf16.mxu0 %v1636_v16  ;;  %v1670_v52 = vld [vmem:[%s2092_s1 + $0x118] sm:$0xff]   ;;  %v1672_v54 = vld [vmem:[%s2092_s1 + $0x160] sm:$0xff]   ;;  %v1676_v58 = vld [vmem:[%s2092_s1 + $0x168] sm:$0xff]  }
  0x12   :  { %1544 = vmatprep.subr.bf16.mxu1 %v1637_v17  ;;  %v1671_v53 = vld [vmem:[%s2092_s1 + $0x198] sm:$0xff]   ;;  %v1673_v55 = vld [vmem:[%s2092_s1 + $0x1e0] sm:$0xff]   ;;  %v1677_v59 = vld [vmem:[%s2092_s1 + $0x1e8] sm:$0xff]   ;;  %v1732_v17 = vmov 0  }
  0x13   :  { %v1674_v56 = vld [vmem:[%s2092_s1 + $0x120] sm:$0xff]   ;;  %v1678_v60 = vld [vmem:[%s2092_s1 + $0x128] sm:$0xff]   ;;  %v1680_v62 = vld [vmem:[%s2092_s1 + $0x170] sm:$0xff]  }
  0x14   :  { %1523 = vmatpush3.bf16.msra.mxu0 %v1638_v18  ;;  %v1675_v57 = vld [vmem:[%s2092_s1 + $0x1a0] sm:$0xff]   ;;  %v1679_v61 = vld [vmem:[%s2092_s1 + $0x1a8] sm:$0xff]   ;;  %v1681_v63 = vld [vmem:[%s2092_s1 + $0x1f0] sm:$0xff]  }
  0x15   :  { %1545 = vmatpush3.bf16.msra.mxu1 %v1639_v19  ;;  %1524 = vmatprep.subr.bf16.mxu0 %v1640_v20  ;;  %v1682_v0 = vld [vmem:[%s2092_s1 + $0x130] sm:$0xff]   ;;  %v1684_v2 = vld [vmem:[%s2092_s1 + $0x178] sm:$0xff]   ;;  %v1694_v12 = vld [vmem:[%s2094_s2 + $0x4] ss:$40 sps:$4 sm:$0xff]  }
  0x16   :  { %1546 = vmatprep.subr.bf16.mxu1 %v1641_v21  ;;  %v1683_v1 = vld [vmem:[%s2092_s1 + $0x1b0] sm:$0xff]   ;;  %v1685_v3 = vld [vmem:[%s2092_s1 + $0x1f8] sm:$0xff]   ;;  %v1692_v13 = vld [vmem:[%s2094_s2] ss:$40 sps:$4 sm:$0xff]  }
  0x17   :  { %v1686_v4 = vld [vmem:[%s2092_s1 + $0x138] sm:$0xff]   ;;  %v26_v6 = vld [vmem:[%s2093_s0 + $0x10] sm:$0xff] }
  0x18   :  { %1525 = vmatpush3.bf16.msra.mxu0 %v1642_v22  ;;  %v1687_v5 = vld [vmem:[%s2092_s1 + $0x1b8] sm:$0xff]   ;;  %v1410_v7 = vcombine.low %v26_v6, %v26_v6  ;;  %v1411_v8 = vcombine.high %v26_v6, %v26_v6  ;;  %v1700_v16 = vld [vmem:[%s2094_s2 + $0xc] ss:$40 sps:$4 sm:$0xff]  }
  0x19   :  { %1547 = vmatpush3.bf16.msra.mxu1 %v1643_v23  ;;  %1526 = vmatprep.subr.bf16.mxu0 %v1644_v24  ;;  %v27_v9 = vld [vmem:[%s2093_s0 + $0x18] sm:$0xff] }
  0x1a   :  { %1548 = vmatprep.subr.bf16.mxu1 %v1645_v25  ;;  %v1412_v10 = vcombine.low %v27_v9, %v27_v9  ;;  %v1413_v11 = vcombine.high %v27_v9, %v27_v9  ;;  %v1697_v14 = vld [vmem:[%s2094_s2 + $0x54] ss:$40 sps:$4 sm:$0xff]   ;;  %v1695_v15 = vld [vmem:[%s2094_s2 + $0x50] ss:$40 sps:$4 sm:$0xff]  }
  0x1c   :  { %1527 = vmatpush3.bf16.msra.mxu0 %v1646_v26 }
  0x1d   :  { %1549 = vmatpush3.bf16.msra.mxu1 %v1647_v27  ;;  %1528 = vmatprep.subr.bf16.mxu0 %v1648_v28 }
  0x1e   :  { %1550 = vmatprep.subr.bf16.mxu1 %v1649_v29 }
  0x20   :  { %1529 = vmatpush3.bf16.msra.mxu0 %v1650_v30 }
  0x21   :  { %1551 = vmatpush3.bf16.msra.mxu1 %v1651_v31  ;;  %1558 = vmatprep.subr.bf16.mxu0 %v1656_v38 }
  0x22   :  { %1580 = vmatprep.subr.bf16.mxu1 %v1657_v39 }
  0x23   :  { %601 = vmatmul.mubr.bf16.vlgmr.msra.gmra.mrb[0].mxu0 %v1406_v34 }
  0x24   :  { %641 = vmatmul.mubr.bf16.vlgmr.msra.gmra.mrb[0].mxu1 %v1408_v36  ;;  %1559 = vmatpush3.bf16.msra.mxu0 %v1658_v40 }
  0x25   :  { %1581 = vmatpush3.bf16.msra.mxu1 %v1659_v41  ;;  %1560 = vmatprep.subr.bf16.mxu0 %v1660_v42  ;;  %v1698_v41 = vld [vmem:[%s2094_s2 + $0x8] ss:$40 sps:$4 sm:$0xff]  }
  0x26   :  { %1582 = vmatprep.subr.bf16.mxu1 %v1661_v43  ;;  %680 = vmatprep.mubr.bf16.mxu0 %v1411_v8  ;;  %v1703_v43 = vld [vmem:[%s2094_s2 + $0x5c] ss:$40 sps:$4 sm:$0xff]  }
  0x27   :  { %720 = vmatprep.mubr.bf16.mxu1 %v1413_v11 }
  0x28   :  { %1561 = vmatpush3.bf16.msra.mxu0 %v1662_v44  ;;  %v1701_v44 = vld [vmem:[%s2094_s2 + $0x58] ss:$40 sps:$4 sm:$0xff]  }
  0x29   :  { %1583 = vmatpush3.bf16.msra.mxu1 %v1663_v45  ;;  %1562 = vmatprep.subr.bf16.mxu0 %v1664_v46  ;;  %v1706_v45 = vld [vmem:[%s2094_s2 + $0x14] ss:$40 sps:$4 sm:$0xff]   ;;  %v1704_v46 = vld [vmem:[%s2094_s2 + $0x10] ss:$40 sps:$4 sm:$0xff]  }
  0x2a   :  { %1584 = vmatprep.subr.bf16.mxu1 %v1665_v47  ;;  %v1709_v47 = vld [vmem:[%s2094_s2 + $0x64] ss:$40 sps:$4 sm:$0xff]  }
  0x2c   :  { %1563 = vmatpush3.bf16.msra.mxu0 %v1666_v48  ;;  %v1707_v48 = vld [vmem:[%s2094_s2 + $0x60] ss:$40 sps:$4 sm:$0xff]  }
  0x2d   :  { %1585 = vmatpush3.bf16.msra.mxu1 %v1667_v49  ;;  %1564 = vmatprep.subr.bf16.mxu0 %v1668_v50  ;;  %v1712_v49 = vld [vmem:[%s2094_s2 + $0x1c] ss:$40 sps:$4 sm:$0xff]   ;;  %v1710_v50 = vld [vmem:[%s2094_s2 + $0x18] ss:$40 sps:$4 sm:$0xff]  }
  0x2e   :  { %1586 = vmatprep.subr.bf16.mxu1 %v1669_v51  ;;  %v1715_v51 = vld [vmem:[%s2094_s2 + $0x6c] ss:$40 sps:$4 sm:$0xff]  }
  0x30   :  { %1565 = vmatpush3.bf16.msra.mxu0 %v1670_v52  ;;  %v1713_v52 = vld [vmem:[%s2094_s2 + $0x68] ss:$40 sps:$4 sm:$0xff]  }
  0x31   :  { %1587 = vmatpush3.bf16.msra.mxu1 %v1671_v53  ;;  %1566 = vmatprep.subr.bf16.mxu0 %v1672_v54  ;;  %v1718_v53 = vld [vmem:[%s2094_s2 + $0x24] ss:$40 sps:$4 sm:$0xff]   ;;  %v1716_v54 = vld [vmem:[%s2094_s2 + $0x20] ss:$40 sps:$4 sm:$0xff]  }
  0x32   :  { %1588 = vmatprep.subr.bf16.mxu1 %v1673_v55  ;;  %v1721_v55 = vld [vmem:[%s2094_s2 + $0x74] ss:$40 sps:$4 sm:$0xff]  }
  0x34   :  { %1567 = vmatpush3.bf16.msra.mxu0 %v1674_v56  ;;  %v1719_v56 = vld [vmem:[%s2094_s2 + $0x70] ss:$40 sps:$4 sm:$0xff]  }
  0x35   :  { %1589 = vmatpush3.bf16.msra.mxu1 %v1675_v57  ;;  %1568 = vmatprep.subr.bf16.mxu0 %v1676_v58  ;;  %v1152_v57 = vld [vmem:[%s2095_s4] sm:$0xff] }
  0x36   :  { %1590 = vmatprep.subr.bf16.mxu1 %v1677_v59  ;;  %v1505_v58 = vcombine.high %v1152_v57, %v1152_v57  ;;  %v1504_v59 = vcombine.low %v1152_v57, %v1152_v57 }
  0x38   :  { %1569 = vmatpush3.bf16.msra.mxu0 %v1678_v60  ;;  %v1153_v60 = vld [vmem:[%s2095_s4 + $0x8] sm:$0xff] }
  0x39   :  { %1591 = vmatpush3.bf16.msra.mxu1 %v1679_v61  ;;  %1570 = vmatprep.subr.bf16.mxu0 %v1680_v62  ;;  %v1507_v61 = vcombine.high %v1153_v60, %v1153_v60  ;;  %v753_v62 = vlaneseq }
  0x3a   :  { %1592 = vmatprep.subr.bf16.mxu1 %v1681_v63 }
  0x3b   :  { %v2043_v63 = vshrl.u32 %v753_v62, 7 }
  0x3c   :  { %1571 = vmatpush3.bf16.msra.mxu0 %v1682_v0 }
  0x3d   :  { %1593 = vmatpush3.bf16.msra.mxu1 %v1683_v1  ;;  %1572 = vmatprep.subr.bf16.mxu0 %v1684_v2  ;;  %v755_v0 = vsub.s32 0, %v2043_v63  ;;  %v2049_v1 = vld [vmem:[%s2096_s3] sm:$0xff]  ;;  %v759_v2 = vsub.s32 1, %v2043_v63  ;;  %v763_v8 = vsub.s32 2, %v2043_v63  ;;  %v767_v11 = vsub.s32 3, %v2043_v63 }
  0x3e   :  { %1594 = vmatprep.subr.bf16.mxu1 %v1685_v3 }
  0x3f   :  { %v756_v3 = vrot.slane %v2049_v1, %v755_v0 }
  0x40   :  { %1573 = vmatpush3.bf16.msra.mxu0 %v1686_v4  ;;  %v760_v4 = vrot.slane %v2049_v1, %v759_v2 }
  0x41   :  { %1595 = vmatpush3.bf16.msra.mxu1 %v1687_v5  ;;  %907 = vmatprep.subr.bf16.mxu0 %v1694_v12 }
  0x42   :  { %1199 = vmatprep.subr.bf16.mxu1 %v1505_v58 }
  0x43   :  { %681 = vmatmul.mubr.bf16.vlgmr.msra.gmra.mrb[4].mxu0 %v1410_v7 }
  0x44   :  { %721 = vmatmul.mubr.bf16.vlgmr.msra.gmra.mrb[4].mxu1 %v1412_v10  ;;  %908 = vmatpush1.bf16.msra.mxu0 %v1692_v13 }
  0x45   :  { %909 = vmatprep.subr.bf16.mxu0 %v1697_v14  ;;  %939 = vmatprep.mubr.bf16.mxu0 %v1732_v17 }
  0x48   :  { %910 = vmatpush1.bf16.msra.mxu0 %v1695_v15 }
  0x49   :  { %948 = vmatprep.subr.bf16.mxu0 %v1700_v16  ;;  %v764_v16 = vrot.slane %v2049_v1, %v763_v8 }
  0x4a   :  { %1200 = vmatpush1.bf16.xpose.msra.mxu1 %v1504_v59 }
  0x4b   :  { %1239 = vmatprep.subr.bf16.mxu1 %v1507_v61  ;;  %v750_v61 = vld [vmem:[%s2096_s3 + $0x8] sm:$0x3] }
  0xf6   :  { %v1530_v18 = vpop.f32.mrb[0].mxu0 }
  0xf7   :  { %v1552_v19 = vpop.f32.mrb[0].mxu1  ;;  %v1531_v20 = vpop.f32.mrb[1].mxu0 }
  0xf8   :  { %v1553_v21 = vpop.f32.mrb[1].mxu1  ;;  %v1532_v22 = vadd.f32 %v1531_v20, %v1530_v18  ;;  %v1533_v24 = vpop.f32.mrb[2].mxu0  ;;  %v768_v18 = vrot.slane %v2049_v1, %v767_v11 }
  0xf9   :  { %v1554_v23 = vadd.f32 %v1553_v21, %v1552_v19  ;;  %v1555_v25 = vpop.f32.mrb[2].mxu1  ;;  %v1534_v26 = vpop.f32.mrb[3].mxu0  ;;  %v1506_v21 = vcombine.low %v1153_v60, %v1153_v60 }
  0xfa   :  { %v1556_v27 = vpop.f32.mrb[3].mxu1 }
  0xfb   :  { %v643_v28 = vadd.f32 %v1554_v23, %v1532_v22 }
 0x116   :  { %v1574_v29 = vpop.f32.mrb[4].mxu0 }
 0x117   :  { %v1596_v30 = vpop.f32.mrb[4].mxu1  ;;  %v1575_v31 = vpop.f32.mrb[5].mxu0 }
 0x118   :  { %v1597_v32 = vpop.f32.mrb[5].mxu1  ;;  %v1576_v33 = vadd.f32 %v1575_v31, %v1574_v29  ;;  %v1577_v35 = vpop.f32.mrb[6].mxu0  ;;  %v775_v29 = vsub.s32 5, %v2043_v63 }
 0x119   :  { %v1598_v34 = vadd.f32 %v1597_v32, %v1596_v30  ;;  %v1599_v36 = vpop.f32.mrb[6].mxu1  ;;  %v1578_v37 = vpop.f32.mrb[7].mxu0 }
 0x11a   :  { %v1600_v38 = vpop.f32.mrb[7].mxu1  ;;  %v683_v39 = vadd.f32 %v1576_v33, %v643_v28  ;;  %v771_v33 = vsub.s32 4, %v2043_v63 }
 0x11c   :  { %v723_v40 = vadd.f32 %v1598_v34, %v683_v39  ;;  %v776_v34 = vrot.slane %v2049_v1, %v775_v29  ;;  %v772_v39 = vrot.slane %v2049_v1, %v771_v33 }
 0x11e   :  { %v728_v42 = vpack.c.bf16 %v723_v40, %v723_v40 }
 0x120   :  { %1498 = vmatmul.mubr.msk.bf16.vlgmr.msra.gmra.mrb[8].mxu0 %vm903_vm0, %v728_v42 }
 0x121   :  { %949 = vmatpush1.bf16.msra.mxu0 %v1698_v41  ;;  %980 = vmatprep.mubr.bf16.mxu0 %v1732_v17  ;;  %v1155_v41 = vld [vmem:[%s2095_s4 + $0x18] sm:$0xff] }
 0x122   :  { %950 = vmatprep.subr.bf16.mxu0 %v1703_v43  ;;  %v1510_v8 = vcombine.low %v1155_v41, %v1155_v41 }
 0x125   :  { %951 = vmatpush1.bf16.msra.mxu0 %v1701_v44  ;;  %v783_v44 = vsub.s32 7, %v2043_v63 }
 0x126   :  { %989 = vmatprep.subr.bf16.mxu0 %v1706_v45 }
 0x128   :  { %1499 = vmatmul.mubr.msk.bf16.vlgmr.msra.gmra.mrb[12].mxu0 %vm903_vm0, %v728_v42 }
 0x129   :  { %990 = vmatpush1.bf16.msra.mxu0 %v1704_v46  ;;  %1021 = vmatprep.mubr.bf16.mxu0 %v1732_v17 }
 0x12a   :  { %991 = vmatprep.subr.bf16.mxu0 %v1709_v47 }
 0x12d   :  { %992 = vmatpush1.bf16.msra.mxu0 %v1707_v48 }
 0x12e   :  { %1030 = vmatprep.subr.bf16.mxu0 %v1712_v49  ;;  %v1511_v49 = vcombine.high %v1155_v41, %v1155_v41 }
 0x130   :  { %1500 = vmatmul.mubr.msk.bf16.vlgmr.msra.gmra.mrb[16].mxu0 %vm903_vm0, %v728_v42 }
 0x131   :  { %1031 = vmatpush1.bf16.msra.mxu0 %v1710_v50  ;;  %1062 = vmatprep.mubr.bf16.mxu0 %v1732_v17 }
 0x132   :  { %1032 = vmatprep.subr.bf16.mxu0 %v1715_v51  ;;  %v784_v51 = vrot.slane %v2049_v1, %v783_v44 }
 0x135   :  { %1033 = vmatpush1.bf16.msra.mxu0 %v1713_v52 }
 0x136   :  { %1071 = vmatprep.subr.bf16.mxu0 %v1718_v53 }
 0x138   :  { %1501 = vmatmul.mubr.msk.bf16.vlgmr.msra.gmra.mrb[20].mxu0 %vm903_vm0, %v728_v42 }
 0x139   :  { %1072 = vmatpush1.bf16.msra.mxu0 %v1716_v54  ;;  %1103 = vmatprep.mubr.bf16.mxu0 %v1732_v17  ;;  %v1154_v17 = vld [vmem:[%s2095_s4 + $0x10] sm:$0xff] }
 0x13a   :  { %1073 = vmatprep.subr.bf16.mxu0 %v1721_v55  ;;  %v1509_v24 = vcombine.high %v1154_v17, %v1154_v17  ;;  %v1508_v46 = vcombine.low %v1154_v17, %v1154_v17 }
 0x13d   :  { %1074 = vmatpush1.bf16.msra.mxu0 %v1719_v56  ;;  %v779_v56 = vsub.s32 6, %v2043_v63 }
 0x140   :  { %1502 = vmatmul.mubr.msk.bf16.vlgmr.msra.gmra.mrb[24].mxu0 %vm903_vm0, %v728_v42 }
 0x1f3   :  { %v941_v5 = vpop.f32.mrb[8].mxu0 }
 0x1f4   :  { %v942_v6 = vadd.f32 %v941_v5, %v756_v3  ;;  %v943_v7 = vpop.f32.mrb[9].mxu0  ;;  %v1156_v5 = vld [vmem:[%s2095_s4 + $0x20] sm:$0xff] }
 0x1f5   :  { %v944_v9 = vadd.f32 %v943_v7, %v760_v4  ;;  %v945_v10 = vpop.f32.mrb[10].mxu0  ;;  %v780_v4 = vrot.slane %v2049_v1, %v779_v56  ;;  %v1513_v11 = vcombine.high %v1156_v5, %v1156_v5 }
 0x1f6   :  { %vm1112_vm1 = vcmp.gt.f32.partialorder %v942_v6, 0.0  ;;  %v1122_v12 = vmul.f32 0.01, %v942_v6  ;;  %v946_v13 = vpop.f32.mrb[11].mxu0 }
 0x1f7   :  { %vm1113_vm2 = vcmp.gt.f32.partialorder %v944_v9, 0.0  ;;  %v1123_v14 = vmul.f32 0.01, %v944_v9 }
 0x1f8   :  { %v1132_v15 = vsel %vm1112_vm1, %v942_v6, %v1122_v12  ;;  %v792_v6 = vrot.slane %v750_v61, %v759_v2 }
 0x1f9   :  { %v1133_v19 = vsel %vm1113_vm2, %v944_v9, %v1123_v14  ;;  %v1142_v22 = vpack.c.bf16 %v1132_v15, %v1132_v15 }
 0x1fa   :  { %v1143_v20 = vpack.c.bf16 %v1133_v19, %v1133_v19  ;;  %v788_v19 = vrot.slane %v750_v61, %v755_v0 }
 0x1fb   :  { %v982_v23 = vpop.f32.mrb[12].mxu0 }
 0x1fc   :  { %v983_v25 = vadd.f32 %v982_v23, %v764_v16  ;;  %v984_v26 = vpop.f32.mrb[13].mxu0  ;;  %1231 = vmatprep.mubr.bf16.mxu1 %v1143_v20 }
 0x1fd   :  { %v985_v27 = vadd.f32 %v984_v26, %v768_v18  ;;  %v986_v28 = vpop.f32.mrb[14].mxu0  ;;  %1232 = vmatmul.mubr.bf16.vlgmr.msra.gmra.mrb[8].mxu1 %v1142_v22 }
 0x1fe   :  { %1240 = vmatpush1.bf16.xpose.msra.mxu1 %v1506_v21  ;;  %v987_v30 = vpop.f32.mrb[15].mxu0  ;;  %v1124_v32 = vmul.f32 0.01, %v983_v25  ;;  %vm1114_vm4 = vcmp.gt.f32.partialorder %v983_v25, 0.0  ;;  %v1512_v21 = vcombine.low %v1156_v5, %v1156_v5  ;;  %v1503_v28 = vld [vmem:[%s2097_s5] ss:$0 sm:$0xff] }
 0x1ff   :  { %vm1115_vm3 = vcmp.gt.f32.partialorder %v985_v27, 0.0  ;;  %v1125_v31 = vmul.f32 0.01, %v985_v27  ;;  %1279 = vmatprep.subr.bf16.mxu1 %v1509_v24 }
 0x200   :  { %v1134_v38 = vsel %vm1114_vm4, %v983_v25, %v1124_v32 }
 0x201   :  { %v1135_v35 = vsel %vm1115_vm3, %v985_v27, %v1125_v31  ;;  %v1144_v47 = vpack.c.bf16 %v1134_v38, %v1134_v38 }
 0x202   :  { %v1145_v36 = vpack.c.bf16 %v1135_v35, %v1135_v35 }
 0x203   :  { %v1023_v37 = vpop.f32.mrb[16].mxu0 }
 0x204   :  { %v1025_v40 = vpop.f32.mrb[17].mxu0  ;;  %1271 = vmatprep.mubr.bf16.mxu1 %v1145_v36  ;;  %v1024_v50 = vadd.f32 %v1023_v37, %v772_v39 }
 0x205   :  { %v1026_v42 = vadd.f32 %v1025_v40, %v776_v34  ;;  %v1027_v43 = vpop.f32.mrb[18].mxu0 }
 0x206   :  { %v1028_v45 = vpop.f32.mrb[19].mxu0  ;;  %v1126_v55 = vmul.f32 0.01, %v1024_v50  ;;  %vm1116_vm6 = vcmp.gt.f32.partialorder %v1024_v50, 0.0 }
 0x207   :  { %vm1117_vm5 = vcmp.gt.f32.partialorder %v1026_v42, 0.0  ;;  %v1127_v48 = vmul.f32 0.01, %v1026_v42 }
 0x208   :  { %v1136_v3 = vsel %vm1116_vm6, %v1024_v50, %v1126_v55 }
 0x209   :  { %1272 = vmatmul.mubr.bf16.vlgmr.msra.gmra.mrb[8].mxu1 %v1144_v47  ;;  %v1137_v52 = vsel %vm1117_vm5, %v1026_v42, %v1127_v48  ;;  %v1146_v9 = vpack.c.bf16 %v1136_v3, %v1136_v3 }
 0x20a   :  { %1280 = vmatpush1.bf16.xpose.msra.mxu1 %v1508_v46  ;;  %v1147_v53 = vpack.c.bf16 %v1137_v52, %v1137_v52 }
 0x20b   :  { %v1064_v54 = vpop.f32.mrb[20].mxu0  ;;  %1319 = vmatprep.subr.bf16.mxu1 %v1511_v49 }
 0x20c   :  { %v1066_v57 = vpop.f32.mrb[21].mxu0  ;;  %1311 = vmatprep.mubr.bf16.mxu1 %v1147_v53  ;;  %v1065_v12 = vadd.f32 %v1064_v54, %v780_v4 }
 0x20d   :  { %v1067_v58 = vadd.f32 %v1066_v57, %v784_v51  ;;  %v1068_v59 = vpop.f32.mrb[22].mxu0 }
 0x20e   :  { %v1069_v60 = vpop.f32.mrb[23].mxu0  ;;  %v1128_v17 = vmul.f32 0.01, %v1065_v12  ;;  %vm1118_vm8 = vcmp.gt.f32.partialorder %v1065_v12, 0.0 }
 0x20f   :  { %vm1119_vm7 = vcmp.gt.f32.partialorder %v1067_v58, 0.0  ;;  %v1129_v62 = vmul.f32 0.01, %v1067_v58 }
 0x210   :  { %v1138_v2 = vsel %vm1118_vm8, %v1065_v12, %v1128_v17 }
 0x211   :  { %v1139_v7 = vsel %vm1119_vm7, %v1067_v58, %v1129_v62  ;;  %v1148_v22 = vpack.c.bf16 %v1138_v2, %v1138_v2 }
 0x212   :  { %v1149_v14 = vpack.c.bf16 %v1139_v7, %v1139_v7 }
 0x213   :  { %v1105_v10 = vpop.f32.mrb[24].mxu0 }
 0x214   :  { %v1107_v13 = vpop.f32.mrb[25].mxu0  ;;  %v1106_v23 = vadd.f32 %v1105_v10, %v788_v19 }
 0x215   :  { %v1108_v15 = vadd.f32 %v1107_v13, %v792_v6  ;;  %v1109_v16 = vpop.f32.mrb[26].mxu0  ;;  %1312 = vmatmul.mubr.bf16.vlgmr.msra.gmra.mrb[8].mxu1 %v1146_v9 }
 0x216   :  { %1320 = vmatpush1.bf16.xpose.msra.mxu1 %v1510_v8  ;;  %v1110_v1 = vpop.f32.mrb[27].mxu0  ;;  %1351 = vmatprep.mubr.bf16.mxu1 %v1149_v14  ;;  %v1130_v25 = vmul.f32 0.01, %v1106_v23  ;;  %vm1120_vm10 = vcmp.gt.f32.partialorder %v1106_v23, 0.0 }
 0x217   :  { %1359 = vmatprep.subr.bf16.mxu1 %v1513_v11  ;;  %v1131_v18 = vmul.f32 0.01, %v1108_v15  ;;  %vm1121_vm9 = vcmp.gt.f32.partialorder %v1108_v15, 0.0 }
 0x218   :  { %v1140_v26 = vsel %vm1120_vm10, %v1106_v23, %v1130_v25 }
 0x219   :  { %v1141_v20 = vsel %vm1121_vm9, %v1108_v15, %v1131_v18  ;;  %v1150_v27 = vpack.c.bf16 %v1140_v26, %v1140_v26 }
 0x21a   :  { %v1151_v24 = vpack.c.bf16 %v1141_v20, %v1141_v20 }
 0x221   :  { %1352 = vmatmul.mubr.bf16.vlgmr.msra.gmra.mrb[8].mxu1 %v1148_v22 }
 0x222   :  { %1360 = vmatpush1.bf16.xpose.msra.mxu1 %v1512_v21  ;;  %1391 = vmatprep.mubr.bf16.mxu1 %v1151_v24 }
 0x22d   :  { %1392 = vmatmul.mubr.bf16.vlgmr.msra.gmra.mrb[8].mxu1 %v1150_v27 }
 0x300   :  { %v1393_v29 = vpop.f32.mrb[8].mxu1 }
 0x301   :  { %v1602_v63 = vadd.f32 %v1503_v28, %v1393_v29  ;;  %v1395_v0 = vpop.f32.mrb[9].mxu1 }
 0x302   :  { %v1396_v30 = vpop.f32.mrb[10].mxu1 }
 0x303   :  { %v1400_v31 = vsel %vm1399_vm11, %v1602_v63, 0.0  ;;  %v1397_v32 = vpop.f32.mrb[11].mxu1 }
 0x304   :  { %1401 = vst [vmem:[%s2098_s6] sm:$0xff] %v1400_v31 }

</bundles_post_ra>
